<compile_context>
chip_gen: v6e
topology: v6e:2x2x1
jax: 0.10.0
libtpu: 0.0.40
codegen_flags: <defaults>
</compile_context>

<pallas_src>
import functools
import math

import jax
import jax.numpy as jnp
from jax.experimental import pallas as pl
from jax.experimental.pallas import tpu as pltpu


def _round_up(x, m):
    return ((x + m - 1) // m) * m


def _actor_kernel(obs_ref, w0_ref, b0_ref, w1_ref, b1_ref, wh_ref, bh_ref,
                  out_ref, *, ap, scale, offset, matmul_dtype):
    """One batch tile: Linear -> ReLU -> Linear -> ReLU -> fused (mu|log_std) head.

    out_ref[:, 0:ap]      = mu        (SquashedNormal base-dist loc)
    out_ref[:, ap:2*ap]   = std       (SquashedNormal base-dist scale)
    out_ref[:, 2*ap:3*ap] = tanh(mu)  (SquashedNormal.mean)
    Only the first A lanes of each ap-wide field carry real data; the padded
    lanes hold finite junk (bias-only outputs) and are sliced off outside.
    """
    x = obs_ref[...].astype(matmul_dtype)
    h = jnp.dot(x, w0_ref[...], preferred_element_type=jnp.float32)
    h = jnp.maximum(h + b0_ref[...], 0.0)
    h = jnp.dot(h.astype(matmul_dtype), w1_ref[...],
                preferred_element_type=jnp.float32)
    h = jnp.maximum(h + b1_ref[...], 0.0)

    # One 2*ap-wide head matmul (single MXU pass of the shared LHS); the split
    # at lane `ap` is tile-aligned.
    head = jnp.dot(h.astype(matmul_dtype), wh_ref[...],
                   preferred_element_type=jnp.float32) + bh_ref[...]
    mu = head[:, :ap]

    # log_std = min + 0.5*(max-min)*(tanh(x)+1)  ==  offset + scale*tanh(x)
    log_std = offset + scale * jnp.tanh(head[:, ap:])

    # Three 128-aligned slab stores into one lane-dense output block.
    out_ref[:, 0:ap] = mu
    out_ref[:, ap:2 * ap] = jnp.exp(log_std)
    out_ref[:, 2 * ap:3 * ap] = jnp.tanh(mu)


def diag_gaussian_actor(obs, params, *, action_dim, log_std_bounds,
                        block_rows=512, matmul_dtype=jnp.bfloat16):
    """Returns (mu, std, squashed_mean) of the SquashedNormal policy."""
    w0, b0, w1, b1, w2, b2 = params
    B, obs_dim = obs.shape
    H = w0.shape[1]
    A = action_dim
    lo, hi = log_std_bounds
    scale = 0.5 * (float(hi) - float(lo))
    offset = float(lo) + scale

    f32 = jnp.float32
    obs_p = _round_up(obs_dim, 128)
    hp = _round_up(H, 128)
    ap = _round_up(A, 128)

    # Zero-pad weights/biases to lane-aligned shapes (exact: padded rows/cols
    # contribute nothing through Linear + ReLU).  MXU operands in matmul_dtype;
    # biases stay f32.
    w0p = jnp.pad(w0, ((0, obs_p - obs_dim), (0, hp - H))).astype(matmul_dtype)
    b0p = jnp.pad(b0, ((0, 0), (0, hp - H))).astype(f32)
    w1p = jnp.pad(w1, ((0, hp - H), (0, hp - H))).astype(matmul_dtype)
    b1p = jnp.pad(b1, ((0, 0), (0, hp - H))).astype(f32)

    # Fused head: w_mu in cols [0, A), w_log_std in cols [ap, ap+A).
    wh = jnp.zeros((hp, 2 * ap), f32)
    wh = wh.at[:H, :A].set(w2[:, :A]).at[:H, ap:ap + A].set(w2[:, A:])
    wh = wh.astype(matmul_dtype)
    bh = jnp.zeros((1, 2 * ap), f32)
    bh = bh.at[:, :A].set(b2[:, :A]).at[:, ap:ap + A].set(b2[:, A:])

    # Adaptive batch tiling: near-even tiles, multiple of the sublane packing.
    align = 16 if jnp.dtype(matmul_dtype).itemsize < 4 else 8
    cap = max(align, int(block_rows))
    n_tiles = -(-B // cap)
    tb = _round_up(-(-B // n_tiles), align)
    pB = n_tiles * tb
    if pB != B or obs_p != obs_dim:
        obs = jnp.pad(obs, ((0, pB - B), (0, obs_p - obs_dim)))

    kernel = functools.partial(_actor_kernel, ap=ap, scale=scale, offset=offset,
                               matmul_dtype=matmul_dtype)

    w_itemsize = jnp.dtype(matmul_dtype).itemsize
    weight_bytes = (obs_p * hp + hp * hp + hp * 2 * ap) * w_itemsize
    bias_bytes = (2 * hp + 2 * ap) * 4
    obs_tile_bytes = tb * obs_p * 4
    out_tile_bytes = tb * 3 * ap * 4
    interm_bytes = 4 * tb * max(hp, 2 * ap) * 4   # a few live f32 intermediates

    def vmem_limit(weight_bufs):
        need = ((weight_bytes + bias_bytes) * weight_bufs
                + 2 * (obs_tile_bytes + out_tile_bytes) + interm_bytes)
        return int(min(max(need * 1.25 + (4 << 20), 8 << 20), 64 << 20))

    flops = 2 * pB * (obs_p * hp + hp * hp + hp * 2 * ap)
    transcendentals = 3 * pB * ap  # tanh(log_std), exp, tanh(mu)
    bytes_accessed = (pB * obs_p * 4 + weight_bytes + bias_bytes
                      + pB * 3 * ap * 4)

    def build(weight_pipeline_mode, weight_bufs):
        def resident(shape):
            # Same block every grid step -> stays VMEM-resident; Buffered(1)
            # keeps only a single copy of each weight in VMEM.
            if weight_pipeline_mode is None:
                return pl.BlockSpec(shape, lambda i: (0, 0))
            return pl.BlockSpec(shape, lambda i: (0, 0),
                                pipeline_mode=weight_pipeline_mode)

        return pl.pallas_call(
            kernel,
            out_shape=jax.ShapeDtypeStruct((pB, 3 * ap), jnp.float32),
            grid=(n_tiles,),
            in_specs=[
                pl.BlockSpec((tb, obs_p), lambda i: (i, 0)),
                resident((obs_p, hp)), resident((1, hp)),
                resident((hp, hp)), resident((1, hp)),
                resident((hp, 2 * ap)), resident((1, 2 * ap)),
            ],
            out_specs=pl.BlockSpec((tb, 3 * ap), lambda i: (i, 0)),
            compiler_params=pltpu.CompilerParams(
                dimension_semantics=("parallel",),
                vmem_limit_bytes=vmem_limit(weight_bufs)),
            cost_estimate=pl.CostEstimate(
                flops=flops, transcendentals=transcendentals,
                bytes_accessed=bytes_accessed),
        )

    args = (obs, w0p, b0p, w1p, b1p, wh, bh)
    try:
        out = build(pl.Buffered(1), 1)(*args)
    except Exception:
        # Fallback: default double-buffered resident specs (correctness
        # identical; only VMEM footprint differs).
        out = build(None, 2)(*args)

    mu = out[:B, :A]
    std = out[:B, ap:ap + A]
    mean = out[:B, 2 * ap:2 * ap + A]
    return mu, std, mean


def init_params(key, obs_dim, hidden_dim, action_dim):
    """Deterministic synthetic init (shapes match util.mlp with hidden_depth=2).

    Linear weights are stored pre-transposed as (in, out) so the kernel does
    x @ W + b, matching PyTorch's y = x @ W.T + b exactly.  Biases are (1, out).
    """
    ks = jax.random.split(key, 6)

    def lin(kw, fan_in, fan_out):
        s = 1.0 / math.sqrt(fan_in)
        return jax.random.uniform(kw, (fan_in, fan_out), jnp.float32, -s, s)

    w0 = lin(ks[0], obs_dim, hidden_dim)
    b0 = jax.random.uniform(ks[1], (1, hidden_dim), jnp.float32, -0.1, 0.1)
    w1 = lin(ks[2], hidden_dim, hidden_dim)
    b1 = jax.random.uniform(ks[3], (1, hidden_dim), jnp.float32, -0.1, 0.1)
    w2 = lin(ks[4], hidden_dim, 2 * action_dim)
    b2 = jax.random.uniform(ks[5], (1, 2 * action_dim), jnp.float32, -0.1, 0.1)
    return (w0, b0, w1, b1, w2, b2)


def reference_forward(obs, params, action_dim, log_std_bounds,
                      matmul_dtype=jnp.float32):
    """Pure-JAX reference of the PyTorch forward, for correctness checks."""
    w0, b0, w1, b1, w2, b2 = params

    def mm(x, w):
        return jnp.dot(x.astype(matmul_dtype), w.astype(matmul_dtype),
                       preferred_element_type=jnp.float32)

    h = jnp.maximum(mm(obs, w0) + b0, 0.0)
    h = jnp.maximum(mm(h, w1) + b1, 0.0)
    out = mm(h, w2) + b2
    mu, log_std = out[:, :action_dim], out[:, action_dim:]
    log_std = jnp.tanh(log_std)
    lo, hi = log_std_bounds
    log_std = lo + 0.5 * (hi - lo) * (log_std + 1.0)
    return mu, jnp.exp(log_std), jnp.tanh(mu)


if __name__ == "__main__":
    # Small shapes consistent with the module.
    B, obs_dim, hidden_dim, action_dim = 8, 16, 32, 4
    log_std_bounds = (-5.0, 2.0)

    key = jax.random.PRNGKey(0)
    k_obs, k_par = jax.random.split(key)
    obs = jax.random.normal(k_obs, (B, obs_dim), dtype=jnp.float32)
    params = init_params(k_par, obs_dim, hidden_dim, action_dim)

    # f32 MXU path: tight match against the pure-JAX reference.
    mu, std, mean = diag_gaussian_actor(
        obs, params, action_dim=action_dim, log_std_bounds=log_std_bounds,
        matmul_dtype=jnp.float32)
    jax.block_until_ready((mu, std, mean))
    mu_r, std_r, mean_r = reference_forward(obs, params, action_dim, log_std_bounds)
    assert jnp.allclose(mu, mu_r, atol=1e-4, rtol=1e-4), "mu mismatch"
    assert jnp.allclose(std, std_r, atol=1e-4, rtol=1e-4), "std mismatch"
    assert jnp.allclose(mean, mean_r, atol=1e-4, rtol=1e-4), "mean mismatch"

    # Ragged batch (not a multiple of the tile) + default bf16 MXU operands
    # (native MXU path on v6e/v7x; elementwise math stays f32).
    B2 = 21
    obs2 = jax.random.normal(jax.random.PRNGKey(1), (B2, obs_dim), jnp.float32)
    mu2, std2, mean2 = diag_gaussian_actor(
        obs2, params, action_dim=action_dim, log_std_bounds=log_std_bounds)
    jax.block_until_ready((mu2, std2, mean2))
    mu2_r, std2_r, mean2_r = reference_forward(
        obs2, params, action_dim, log_std_bounds, matmul_dtype=jnp.bfloat16)
    assert jnp.allclose(mu2, mu2_r, atol=2e-2, rtol=2e-2), "bf16 mu mismatch"
    assert jnp.allclose(std2, std2_r, atol=2e-2, rtol=2e-2), "bf16 std mismatch"
    assert jnp.allclose(mean2, mean2_r, atol=2e-2, rtol=2e-2), "bf16 mean mismatch"

    # TODO(synk): SquashedNormal's rsample()/log_prob() (stochastic Transformed-
    # Distribution methods) are not part of forward()'s deterministic compute;
    # the caller can build them from (mu, std) returned here.
    print("KERNEL_OK")
</pallas_src>

<mosaic_0001>
module attributes {stable_mosaic.version = 11 : i64} {
  func.func @_actor_kernel(%arg0: i32, %arg1: memref<8x128xf32, #tpu.memory_space<vmem>>, %arg2: memref<128x128xf32, #tpu.memory_space<vmem>>, %arg3: memref<1x128xf32, #tpu.memory_space<vmem>>, %arg4: memref<128x128xf32, #tpu.memory_space<vmem>>, %arg5: memref<1x128xf32, #tpu.memory_space<vmem>>, %arg6: memref<128x256xf32, #tpu.memory_space<vmem>>, %arg7: memref<1x256xf32, #tpu.memory_space<vmem>>, %arg8: memref<8x384xf32, #tpu.memory_space<vmem>>) attributes {dimension_semantics = [#tpu.dimension_semantics<parallel>], iteration_bounds = array<i64: 1>, scalar_prefetch = 0 : i64, scratch_operands = 0 : i64, tpu.core_type = #tpu.core_type<tc>, window_params = [{transform_indices = @transform_0, window_bounds = array<i64: 8, 128>}, {pipeline_mode = #tpu.pipeline_mode<synchronous>, transform_indices = @transform_1, window_bounds = array<i64: 128, 128>}, {pipeline_mode = #tpu.pipeline_mode<synchronous>, transform_indices = @transform_2, window_bounds = array<i64: 1, 128>}, {pipeline_mode = #tpu.pipeline_mode<synchronous>, transform_indices = @transform_3, window_bounds = array<i64: 128, 128>}, {pipeline_mode = #tpu.pipeline_mode<synchronous>, transform_indices = @transform_4, window_bounds = array<i64: 1, 128>}, {pipeline_mode = #tpu.pipeline_mode<synchronous>, transform_indices = @transform_5, window_bounds = array<i64: 128, 256>}, {pipeline_mode = #tpu.pipeline_mode<synchronous>, transform_indices = @transform_6, window_bounds = array<i64: 1, 256>}, {transform_indices = @transform_7, window_bounds = array<i64: 8, 384>}]} {
    %c0 = arith.constant 0 : index
    %c0_0 = arith.constant 0 : index
    %0 = vector.load %arg1[%c0, %c0_0] : memref<8x128xf32, #tpu.memory_space<vmem>>, vector<8x128xf32>
    %c0_1 = arith.constant 0 : index
    %c0_2 = arith.constant 0 : index
    %1 = vector.load %arg2[%c0_1, %c0_2] : memref<128x128xf32, #tpu.memory_space<vmem>>, vector<128x128xf32>
    %cst = arith.constant dense<0.000000e+00> : vector<8x128xf32>
    %2 = tpu.matmul %0, %1, %cst {dimension_numbers = #tpu.dot_dimension_numbers<[1], [0], [0], [1], [0, 0, 1, 1], [], []>} : vector<8x128xf32>, vector<128x128xf32>, vector<8x128xf32> -> vector<8x128xf32>
    %c0_3 = arith.constant 0 : index
    %c0_4 = arith.constant 0 : index
    %3 = vector.load %arg3[%c0_3, %c0_4] : memref<1x128xf32, #tpu.memory_space<vmem>>, vector<1x128xf32>
    %4 = vector.broadcast %3 : vector<1x128xf32> to vector<8x128xf32>
    %5 = arith.addf %2, %4 : vector<8x128xf32>
    %cst_5 = arith.constant 0.000000e+00 : f32
    %6 = vector.broadcast %cst_5 : f32 to vector<8x128xf32>
    %7 = arith.maximumf %5, %6 : vector<8x128xf32>
    %c0_6 = arith.constant 0 : index
    %c0_7 = arith.constant 0 : index
    %8 = vector.load %arg4[%c0_6, %c0_7] : memref<128x128xf32, #tpu.memory_space<vmem>>, vector<128x128xf32>
    %cst_8 = arith.constant dense<0.000000e+00> : vector<8x128xf32>
    %9 = tpu.matmul %7, %8, %cst_8 {dimension_numbers = #tpu.dot_dimension_numbers<[1], [0], [0], [1], [0, 0, 1, 1], [], []>} : vector<8x128xf32>, vector<128x128xf32>, vector<8x128xf32> -> vector<8x128xf32>
    %c0_9 = arith.constant 0 : index
    %c0_10 = arith.constant 0 : index
    %10 = vector.load %arg5[%c0_9, %c0_10] : memref<1x128xf32, #tpu.memory_space<vmem>>, vector<1x128xf32>
    %11 = vector.broadcast %10 : vector<1x128xf32> to vector<8x128xf32>
    %12 = arith.addf %9, %11 : vector<8x128xf32>
    %cst_11 = arith.constant 0.000000e+00 : f32
    %13 = vector.broadcast %cst_11 : f32 to vector<8x128xf32>
    %14 = arith.maximumf %12, %13 : vector<8x128xf32>
    %c0_12 = arith.constant 0 : index
    %c0_13 = arith.constant 0 : index
    %15 = vector.load %arg6[%c0_12, %c0_13] : memref<128x256xf32, #tpu.memory_space<vmem>>, vector<128x256xf32>
    %cst_14 = arith.constant dense<0.000000e+00> : vector<8x256xf32>
    %16 = tpu.matmul %14, %15, %cst_14 {dimension_numbers = #tpu.dot_dimension_numbers<[1], [0], [0], [1], [0, 0, 1, 1], [], []>} : vector<8x128xf32>, vector<128x256xf32>, vector<8x256xf32> -> vector<8x256xf32>
    %c0_15 = arith.constant 0 : index
    %c0_16 = arith.constant 0 : index
    %17 = vector.load %arg7[%c0_15, %c0_16] : memref<1x256xf32, #tpu.memory_space<vmem>>, vector<1x256xf32>
    %18 = vector.broadcast %17 : vector<1x256xf32> to vector<8x256xf32>
    %19 = arith.addf %16, %18 : vector<8x256xf32>
    %20 = vector.extract_strided_slice %19 {offsets = [0, 0], sizes = [8, 128], strides = [1, 1]} : vector<8x256xf32> to vector<8x128xf32>
    %21 = vector.extract_strided_slice %19 {offsets = [0, 128], sizes = [8, 128], strides = [1, 1]} : vector<8x256xf32> to vector<8x128xf32>
    %22 = math.tanh %21 : vector<8x128xf32>
    %cst_17 = arith.constant 3.500000e+00 : f32
    %23 = vector.broadcast %cst_17 : f32 to vector<8x128xf32>
    %24 = arith.mulf %23, %22 : vector<8x128xf32>
    %cst_18 = arith.constant -1.500000e+00 : f32
    %25 = vector.broadcast %cst_18 : f32 to vector<8x128xf32>
    %26 = arith.addf %25, %24 : vector<8x128xf32>
    %c0_19 = arith.constant 0 : index
    %c0_20 = arith.constant 0 : index
    %27 = vector.load %arg8[%c0_19, %c0_20] : memref<8x384xf32, #tpu.memory_space<vmem>>, vector<8x128xf32>
    tpu.vector_store %arg8[%c0_19, %c0_20], %20 {strides = array<i32>} : memref<8x384xf32, #tpu.memory_space<vmem>>, vector<8x128xf32>,
    %28 = math.exp %26 : vector<8x128xf32>
    %c0_21 = arith.constant 0 : index
    %c128 = arith.constant 128 : index
    %29 = vector.load %arg8[%c0_21, %c128] : memref<8x384xf32, #tpu.memory_space<vmem>>, vector<8x128xf32>
    tpu.vector_store %arg8[%c0_21, %c128], %28 {strides = array<i32>} : memref<8x384xf32, #tpu.memory_space<vmem>>, vector<8x128xf32>,
    %30 = math.tanh %20 : vector<8x128xf32>
    %c0_22 = arith.constant 0 : index
    %c256 = arith.constant 256 : index
    %31 = vector.load %arg8[%c0_22, %c256] : memref<8x384xf32, #tpu.memory_space<vmem>>, vector<8x128xf32>
    tpu.vector_store %arg8[%c0_22, %c256], %30 {strides = array<i32>} : memref<8x384xf32, #tpu.memory_space<vmem>>, vector<8x128xf32>,
    return
  }
  func.func @transform_0(%arg0: i32) -> (i32, i32) {
    %c0_i32 = arith.constant 0 : i32
    %c0_i32_0 = arith.constant 0 : i32
    return %arg0, %c0_i32 : i32, i32
  }
  func.func @transform_1(%arg0: i32) -> (i32, i32) {
    %c0_i32 = arith.constant 0 : i32
    %c0_i32_0 = arith.constant 0 : i32
    %c0_i32_1 = arith.constant 0 : i32
    return %c0_i32, %c0_i32_0 : i32, i32
  }
  func.func @transform_2(%arg0: i32) -> (i32, i32) {
    %c0_i32 = arith.constant 0 : i32
    %c0_i32_0 = arith.constant 0 : i32
    %c0_i32_1 = arith.constant 0 : i32
    return %c0_i32, %c0_i32_0 : i32, i32
  }
  func.func @transform_3(%arg0: i32) -> (i32, i32) {
    %c0_i32 = arith.constant 0 : i32
    %c0_i32_0 = arith.constant 0 : i32
    %c0_i32_1 = arith.constant 0 : i32
    return %c0_i32, %c0_i32_0 : i32, i32
  }
  func.func @transform_4(%arg0: i32) -> (i32, i32) {
    %c0_i32 = arith.constant 0 : i32
    %c0_i32_0 = arith.constant 0 : i32
    %c0_i32_1 = arith.constant 0 : i32
    return %c0_i32, %c0_i32_0 : i32, i32
  }
  func.func @transform_5(%arg0: i32) -> (i32, i32) {
    %c0_i32 = arith.constant 0 : i32
    %c0_i32_0 = arith.constant 0 : i32
    %c0_i32_1 = arith.constant 0 : i32
    return %c0_i32, %c0_i32_0 : i32, i32
  }
  func.func @transform_6(%arg0: i32) -> (i32, i32) {
    %c0_i32 = arith.constant 0 : i32
    %c0_i32_0 = arith.constant 0 : i32
    %c0_i32_1 = arith.constant 0 : i32
    return %c0_i32, %c0_i32_0 : i32, i32
  }
  func.func @transform_7(%arg0: i32) -> (i32, i32) {
    %c0_i32 = arith.constant 0 : i32
    %c0_i32_0 = arith.constant 0 : i32
    return %arg0, %c0_i32 : i32, i32
  }
}

module attributes {stable_mosaic.version = 11 : i64} {
  func.func @_actor_kernel(%arg0: i32, %arg1: memref<8x128xf32, #tpu.memory_space<vmem>>, %arg2: memref<128x128xf32, #tpu.memory_space<vmem>>, %arg3: memref<1x128xf32, #tpu.memory_space<vmem>>, %arg4: memref<128x128xf32, #tpu.memory_space<vmem>>, %arg5: memref<1x128xf32, #tpu.memory_space<vmem>>, %arg6: memref<128x256xf32, #tpu.memory_space<vmem>>, %arg7: memref<1x256xf32, #tpu.memory_space<vmem>>, %arg8: memref<8x384xf32, #tpu.memory_space<vmem>>) attributes {dimension_semantics = [#tpu.dimension_semantics<parallel>], iteration_bounds = array<i64: 1>, scalar_prefetch = 0 : i64, scratch_operands = 0 : i64, tpu.core_type = #tpu.core_type<tc>, window_params = [{transform_indices = @transform_0, window_bounds = array<i64: 8, 128>}, {pipeline_mode = #tpu.pipeline_mode<synchronous>, transform_indices = @transform_1, window_bounds = array<i64: 128, 128>}, {pipeline_mode = #tpu.pipeline_mode<synchronous>, transform_indices = @transform_2, window_bounds = array<i64: 1, 128>}, {pipeline_mode = #tpu.pipeline_mode<synchronous>, transform_indices = @transform_3, window_bounds = array<i64: 128, 128>}, {pipeline_mode = #tpu.pipeline_mode<synchronous>, transform_indices = @transform_4, window_bounds = array<i64: 1, 128>}, {pipeline_mode = #tpu.pipeline_mode<synchronous>, transform_indices = @transform_5, window_bounds = array<i64: 128, 256>}, {pipeline_mode = #tpu.pipeline_mode<synchronous>, transform_indices = @transform_6, window_bounds = array<i64: 1, 256>}, {transform_indices = @transform_7, window_bounds = array<i64: 8, 384>}]} {
    %c0 = arith.constant 0 : index
    %c0_0 = arith.constant 0 : index
    %0 = vector.load %arg1[%c0, %c0_0] : memref<8x128xf32, #tpu.memory_space<vmem>>, vector<8x128xf32>
    %c0_1 = arith.constant 0 : index
    %c0_2 = arith.constant 0 : index
    %1 = vector.load %arg2[%c0_1, %c0_2] : memref<128x128xf32, #tpu.memory_space<vmem>>, vector<128x128xf32>
    %cst = arith.constant dense<0.000000e+00> : vector<8x128xf32>
    %2 = tpu.matmul %0, %1, %cst {dimension_numbers = #tpu.dot_dimension_numbers<[1], [0], [0], [1], [0, 0, 1, 1], [], []>} : vector<8x128xf32>, vector<128x128xf32>, vector<8x128xf32> -> vector<8x128xf32>
    %c0_3 = arith.constant 0 : index
    %c0_4 = arith.constant 0 : index
    %3 = vector.load %arg3[%c0_3, %c0_4] : memref<1x128xf32, #tpu.memory_space<vmem>>, vector<1x128xf32>
    %4 = vector.broadcast %3 : vector<1x128xf32> to vector<8x128xf32>
    %5 = arith.addf %2, %4 : vector<8x128xf32>
    %cst_5 = arith.constant 0.000000e+00 : f32
    %6 = vector.broadcast %cst_5 : f32 to vector<8x128xf32>
    %7 = arith.maximumf %5, %6 : vector<8x128xf32>
    %c0_6 = arith.constant 0 : index
    %c0_7 = arith.constant 0 : index
    %8 = vector.load %arg4[%c0_6, %c0_7] : memref<128x128xf32, #tpu.memory_space<vmem>>, vector<128x128xf32>
    %cst_8 = arith.constant dense<0.000000e+00> : vector<8x128xf32>
    %9 = tpu.matmul %7, %8, %cst_8 {dimension_numbers = #tpu.dot_dimension_numbers<[1], [0], [0], [1], [0, 0, 1, 1], [], []>} : vector<8x128xf32>, vector<128x128xf32>, vector<8x128xf32> -> vector<8x128xf32>
    %c0_9 = arith.constant 0 : index
    %c0_10 = arith.constant 0 : index
    %10 = vector.load %arg5[%c0_9, %c0_10] : memref<1x128xf32, #tpu.memory_space<vmem>>, vector<1x128xf32>
    %11 = vector.broadcast %10 : vector<1x128xf32> to vector<8x128xf32>
    %12 = arith.addf %9, %11 : vector<8x128xf32>
    %cst_11 = arith.constant 0.000000e+00 : f32
    %13 = vector.broadcast %cst_11 : f32 to vector<8x128xf32>
    %14 = arith.maximumf %12, %13 : vector<8x128xf32>
    %c0_12 = arith.constant 0 : index
    %c0_13 = arith.constant 0 : index
    %15 = vector.load %arg6[%c0_12, %c0_13] : memref<128x256xf32, #tpu.memory_space<vmem>>, vector<128x256xf32>
    %cst_14 = arith.constant dense<0.000000e+00> : vector<8x256xf32>
    %16 = tpu.matmul %14, %15, %cst_14 {dimension_numbers = #tpu.dot_dimension_numbers<[1], [0], [0], [1], [0, 0, 1, 1], [], []>} : vector<8x128xf32>, vector<128x256xf32>, vector<8x256xf32> -> vector<8x256xf32>
    %c0_15 = arith.constant 0 : index
    %c0_16 = arith.constant 0 : index
    %17 = vector.load %arg7[%c0_15, %c0_16] : memref<1x256xf32, #tpu.memory_space<vmem>>, vector<1x256xf32>
    %18 = vector.broadcast %17 : vector<1x256xf32> to vector<8x256xf32>
    %19 = arith.addf %16, %18 : vector<8x256xf32>
    %20 = vector.extract_strided_slice %19 {offsets = [0, 0], sizes = [8, 128], strides = [1, 1]} : vector<8x256xf32> to vector<8x128xf32>
    %21 = vector.extract_strided_slice %19 {offsets = [0, 128], sizes = [8, 128], strides = [1, 1]} : vector<8x256xf32> to vector<8x128xf32>
    %22 = math.tanh %21 : vector<8x128xf32>
    %cst_17 = arith.constant 3.500000e+00 : f32
    %23 = vector.broadcast %cst_17 : f32 to vector<8x128xf32>
    %24 = arith.mulf %23, %22 : vector<8x128xf32>
    %cst_18 = arith.constant -1.500000e+00 : f32
    %25 = vector.broadcast %cst_18 : f32 to vector<8x128xf32>
    %26 = arith.addf %25, %24 : vector<8x128xf32>
    %c0_19 = arith.constant 0 : index
    %c0_20 = arith.constant 0 : index
    %27 = vector.load %arg8[%c0_19, %c0_20] : memref<8x384xf32, #tpu.memory_space<vmem>>, vector<8x128xf32>
    tpu.vector_store %arg8[%c0_19, %c0_20], %20 {strides = array<i32>} : memref<8x384xf32, #tpu.memory_space<vmem>>, vector<8x128xf32>,
    %28 = math.exp %26 : vector<8x128xf32>
    %c0_21 = arith.constant 0 : index
    %c128 = arith.constant 128 : index
    %29 = vector.load %arg8[%c0_21, %c128] : memref<8x384xf32, #tpu.memory_space<vmem>>, vector<8x128xf32>
    tpu.vector_store %arg8[%c0_21, %c128], %28 {strides = array<i32>} : memref<8x384xf32, #tpu.memory_space<vmem>>, vector<8x128xf32>,
    %30 = math.tanh %20 : vector<8x128xf32>
    %c0_22 = arith.constant 0 : index
    %c256 = arith.constant 256 : index
    %31 = vector.load %arg8[%c0_22, %c256] : memref<8x384xf32, #tpu.memory_space<vmem>>, vector<8x128xf32>
    tpu.vector_store %arg8[%c0_22, %c256], %30 {strides = array<i32>} : memref<8x384xf32, #tpu.memory_space<vmem>>, vector<8x128xf32>,
    return
  }
  func.func @transform_0(%arg0: i32) -> (i32, i32) {
    %c0_i32 = arith.constant 0 : i32
    %c0_i32_0 = arith.constant 0 : i32
    return %arg0, %c0_i32 : i32, i32
  }
  func.func @transform_1(%arg0: i32) -> (i32, i32) {
    %c0_i32 = arith.constant 0 : i32
    %c0_i32_0 = arith.constant 0 : i32
    %c0_i32_1 = arith.constant 0 : i32
    return %c0_i32, %c0_i32_0 : i32, i32
  }
  func.func @transform_2(%arg0: i32) -> (i32, i32) {
    %c0_i32 = arith.constant 0 : i32
    %c0_i32_0 = arith.constant 0 : i32
    %c0_i32_1 = arith.constant 0 : i32
    return %c0_i32, %c0_i32_0 : i32, i32
  }
  func.func @transform_3(%arg0: i32) -> (i32, i32) {
    %c0_i32 = arith.constant 0 : i32
    %c0_i32_0 = arith.constant 0 : i32
    %c0_i32_1 = arith.constant 0 : i32
    return %c0_i32, %c0_i32_0 : i32, i32
  }
  func.func @transform_4(%arg0: i32) -> (i32, i32) {
    %c0_i32 = arith.constant 0 : i32
    %c0_i32_0 = arith.constant 0 : i32
    %c0_i32_1 = arith.constant 0 : i32
    return %c0_i32, %c0_i32_0 : i32, i32
  }
  func.func @transform_5(%arg0: i32) -> (i32, i32) {
    %c0_i32 = arith.constant 0 : i32
    %c0_i32_0 = arith.constant 0 : i32
    %c0_i32_1 = arith.constant 0 : i32
    return %c0_i32, %c0_i32_0 : i32, i32
  }
  func.func @transform_6(%arg0: i32) -> (i32, i32) {
    %c0_i32 = arith.constant 0 : i32
    %c0_i32_0 = arith.constant 0 : i32
    %c0_i32_1 = arith.constant 0 : i32
    return %c0_i32, %c0_i32_0 : i32, i32
  }
  func.func @transform_7(%arg0: i32) -> (i32, i32) {
    %c0_i32 = arith.constant 0 : i32
    %c0_i32_0 = arith.constant 0 : i32
    return %arg0, %c0_i32 : i32, i32
  }
}

</mosaic_0001>

<bundles_post_ra>
// kernel: tpu_custom_call.1
= control target key start
LH: loop header
LB: loop body
LE: loop exit
PB: predicated region body
PF: predicated region fallthrough
CT: control target
= control target key end

     0   :  { %12 = vsyncpa [#allocation3], 0  ;;  %s751_s0 = inlined_call_operand.hbm [shape: f32[8,128], index: 0, kind: input, shape index: {}]   ;;  %s752_s1 = inlined_call_operand.hbm [shape: f32[128,128], index: 1, kind: input, shape index: {}]   ;;  %s753_s2 = inlined_call_operand.vmem [shape: f32[1,128], index: 2, kind: input, shape index: {}]   ;;  %s754_s3 = inlined_call_operand.hbm [shape: f32[128,128], index: 3, kind: input, shape index: {}]   ;;  %s755_s4 = inlined_call_operand.vmem [shape: f32[1,128], index: 4, kind: input, shape index: {}]   ;;  %s756_s5 = inlined_call_operand.hbm [shape: f32[128,256], index: 5, kind: input, shape index: {}]   ;;  %s757_s6 = inlined_call_operand.vmem [shape: f32[1,256], index: 6, kind: input, shape index: {}]   ;;  %s758_s7 = inlined_call_operand.hbm [shape: f32[8,384], index: 7, kind: output, shape index: {}]  }
   0x1   :  { %13 = vsyncpa [#allocation6], 0 }
   0x2   :  { %14 = vsyncpa [#allocation9], 0 }
   0x3   :  { %15 = vsyncpa [#allocation4], 0  ;;  %s641_s24 = smov [#allocation5]  }
   0x4   :  { %s31_s25 = sshll.u32 %s641_s24, 4  ;;  %s32_s25 = int_to_ptr.vmem [resolvable:$true] %s31_s25 }
   0x5   :  { %s541_s26 = scalar_lea.vmem %s32_s25, 2048  ;;  %p546_p1 = scmp.lt.s32.totalorder %s32_s25, %s32_s25 }
   0x6   :  { %p542_p0 = scmp.ne.s32.totalorder %s32_s25, %s541_s26  ;;  %p547_p2 = scmp.lt.s32.totalorder %s541_s26, %s541_s26 }
   0x8   :  { %p548_p3 = por %p547_p2, %p546_p1 }
   0xa   :  { %p549_p4 = pnand %p548_p3, %p542_p0 }
   0xc   :  { %552 = shalt.err (!%p549_p4)
}
   0xd   :  { %s642_s27 = smov 128   ;;  %s643_s28 = smov 8  }
   0xe   :  { %37 = dma.hbm_to_vmem [thread:$0]  %s752_s1, 2048, %s32_s25, [#allocation6], %s642_s27, %s642_s27, %s643_s28  }
   0xf   :  { %s644_s8 = smov [#allocation2]   ;;  %s645_s10 = smov [#allocation7]  }
  0x10   :  { %s22_s9 = sshll.u32 %s644_s8, 4  ;;  %s45_s11 = sshll.u32 %s645_s10, 4  ;;  %s23_s9 = int_to_ptr.vmem [resolvable:$true] %s22_s9  ;;  %s46_s11 = int_to_ptr.vmem [resolvable:$true] %s45_s11 }
  0x11   :  { %s561_s12 = scalar_lea.vmem %s23_s9, 128  ;;  %p566_p6 = scmp.lt.s32.totalorder %s23_s9, %s23_s9 }
  0x12   :  { %p562_p5 = scmp.ne.s32.totalorder %s23_s9, %s561_s12  ;;  %p567_p7 = scmp.lt.s32.totalorder %s561_s12, %s561_s12 }
  0x14   :  { %p568_p8 = por %p567_p7, %p566_p6 }
  0x16   :  { %p569_p9 = pnand %p568_p8, %p562_p5 }
  0x18   :  { %572 = shalt.err (!%p569_p9)
}
  0x19   :  { %25 = dma.hbm_to_vmem [thread:$0]  %s751_s0, 128, %s23_s9, [#allocation3]  }
  0x1a   :  { %s581_s15 = scalar_lea.vmem %s46_s11, 2048  ;;  %p586_p11 = scmp.lt.s32.totalorder %s46_s11, %s46_s11 }
  0x1b   :  { %p582_p10 = scmp.ne.s32.totalorder %s46_s11, %s581_s15  ;;  %p587_p12 = scmp.lt.s32.totalorder %s581_s15, %s581_s15 }
  0x1d   :  { %p588_p13 = por %p587_p12, %p586_p11 }
  0x1f   :  { %p589_p0 = pnand %p588_p13, %p582_p10 }
  0x21   :  { %592 = shalt.err (!%p589_p0)
}
  0x22   :  { %51 = dma.hbm_to_vmem [thread:$0]  %s754_s3, 2048, %s46_s11, [#allocation6], %s642_s27, %s642_s27, %s643_s28  }
  0x23   :  { %s646_s17 = smov [#allocation8]  }
  0x24   :  { %s59_s18 = sshll.u32 %s646_s17, 4  ;;  %s60_s18 = int_to_ptr.vmem [resolvable:$true] %s59_s18 }
  0x25   :  { %s601_s19 = scalar_lea.vmem %s60_s18, 4096  ;;  %p606_p2 = scmp.lt.s32.totalorder %s60_s18, %s60_s18 }
  0x26   :  { %p602_p1 = scmp.ne.s32.totalorder %s60_s18, %s601_s19  ;;  %p607_p3 = scmp.lt.s32.totalorder %s601_s19, %s601_s19 }
  0x28   :  { %p608_p4 = por %p607_p3, %p606_p2 }
  0x2a   :  { %p609_p5 = pnand %p608_p4, %p602_p1 }
  0x2c   :  { %612 = shalt.err (!%p609_p5)
}
  0x2d   :  { %s647_s0 = smov 256   ;;  %s648_s20 = smov 16  }
  0x2e   :  { %65 = dma.hbm_to_vmem [thread:$0]  %s756_s5, 4096, %s60_s18, [#allocation9], %s647_s0, %s647_s0, %s648_s20  }
  0x2f   :  { %633 = dma.done.wait [#allocation3], 128  }
  0x30   :  { %634 = vsyncadd [#allocation3], 4294967168 }
  0x31   :  { %635 = dma.done.wait [#allocation6], 4096  }
  0x32   :  { %636 = vsyncadd [#allocation6], 4294963200 }
  0x33   :  { %637 = dma.done.wait [#allocation9], 4096  }
  0x34   :  { %638 = vsyncadd [#allocation9], 4294963200  ;;  %v649_v0 = vmov 0.0   ;;  %vm650_vm0 = vmmov 0   ;;  %v96_v1 = vld [vmem:[#allocation5 + $0x78] sm:$0xff]  ;;  %v95_v2 = vld [vmem:[#allocation5 + $0x70] sm:$0xff] }
  0x35   :  { %446 = vmatprep.subr.mxu0 %v649_v0  ;;  %478 = vmatprep.mubr.msk.f32.mxu0 %vm650_vm0, %v649_v0  ;;  %v94_v3 = vld [vmem:[#allocation5 + $0x68] sm:$0xff]  ;;  %v93_v4 = vld [vmem:[#allocation5 + $0x60] sm:$0xff]  ;;  %v190_v5 = vld [vmem:[#allocation7 + $0x78] sm:$0xff] }
  0x36   :  { %481 = vmatprep.subr.mxu1 %v649_v0  ;;  %513 = vmatprep.mubr.msk.f32.mxu1 %vm650_vm0, %v649_v0  ;;  %v92_v6 = vld [vmem:[#allocation5 + $0x58] sm:$0xff]  ;;  %v189_v7 = vld [vmem:[#allocation7 + $0x70] sm:$0xff]  ;;  %v188_v8 = vld [vmem:[#allocation7 + $0x68] sm:$0xff] }
  0x37   :  { %447 = vmatpush3.msra.mxu0 %v96_v1  ;;  %482 = vmatpush3.msra.mxu1 %v190_v5  ;;  %v91_v9 = vld [vmem:[#allocation5 + $0x50] sm:$0xff]  ;;  %v187_v10 = vld [vmem:[#allocation7 + $0x60] sm:$0xff]  ;;  %v90_v11 = vld [vmem:[#allocation5 + $0x48] sm:$0xff] }
  0x38   :  { %448 = vmatprep.subr.mxu0 %v649_v0  ;;  %483 = vmatprep.subr.mxu1 %v649_v0  ;;  %v186_v12 = vld [vmem:[#allocation7 + $0x58] sm:$0xff]  ;;  %v89_v13 = vld [vmem:[#allocation5 + $0x40] sm:$0xff]  ;;  %v185_v14 = vld [vmem:[#allocation7 + $0x50] sm:$0xff] }
  0x39   :  { %449 = vmatpush3.msra.mxu0 %v95_v2  ;;  %484 = vmatpush3.msra.mxu1 %v189_v7  ;;  %v88_v15 = vld [vmem:[#allocation5 + $0x38] sm:$0xff]  ;;  %v184_v16 = vld [vmem:[#allocation7 + $0x48] sm:$0xff]  ;;  %v87_v17 = vld [vmem:[#allocation5 + $0x30] sm:$0xff] }
  0x3a   :  { %450 = vmatprep.subr.mxu0 %v649_v0  ;;  %485 = vmatprep.subr.mxu1 %v649_v0  ;;  %v183_v18 = vld [vmem:[#allocation7 + $0x40] sm:$0xff]  ;;  %v86_v19 = vld [vmem:[#allocation5 + $0x28] sm:$0xff]  ;;  %v182_v20 = vld [vmem:[#allocation7 + $0x38] sm:$0xff] }
  0x3b   :  { %451 = vmatpush3.msra.mxu0 %v94_v3  ;;  %486 = vmatpush3.msra.mxu1 %v188_v8  ;;  %v85_v21 = vld [vmem:[#allocation5 + $0x20] sm:$0xff]  ;;  %v181_v22 = vld [vmem:[#allocation7 + $0x30] sm:$0xff]  ;;  %v84_v23 = vld [vmem:[#allocation5 + $0x18] sm:$0xff] }
  0x3c   :  { %452 = vmatprep.subr.mxu0 %v649_v0  ;;  %487 = vmatprep.subr.mxu1 %v649_v0  ;;  %v180_v24 = vld [vmem:[#allocation7 + $0x28] sm:$0xff]  ;;  %v83_v25 = vld [vmem:[#allocation5 + $0x10] sm:$0xff]  ;;  %v179_v26 = vld [vmem:[#allocation7 + $0x20] sm:$0xff] }
  0x3d   :  { %453 = vmatpush3.msra.mxu0 %v93_v4  ;;  %488 = vmatpush3.msra.mxu1 %v187_v10  ;;  %v82_v27 = vld [vmem:[#allocation5 + $0x8] sm:$0xff]  ;;  %v178_v28 = vld [vmem:[#allocation7 + $0x18] sm:$0xff]  ;;  %v81_v29 = vld [vmem:[#allocation5] sm:$0xff] }
  0x3e   :  { %454 = vmatprep.subr.mxu0 %v649_v0  ;;  %489 = vmatprep.subr.mxu1 %v649_v0  ;;  %v80_v30 = vld [vmem:[#allocation2] sm:$0xff]  ;;  %v177_v31 = vld [vmem:[#allocation7 + $0x10] sm:$0xff]  ;;  %v176_v32 = vld [vmem:[#allocation7 + $0x8] sm:$0xff] }
  0x3f   :  { %455 = vmatpush3.msra.mxu0 %v92_v6  ;;  %490 = vmatpush3.msra.mxu1 %v186_v12  ;;  %v175_v33 = vld [vmem:[#allocation7] sm:$0xff]  ;;  %v300_v34 = vld [vmem:[#allocation8 + $0xf8] sm:$0xff]  ;;  %v299_v35 = vld [vmem:[#allocation8 + $0xf0] sm:$0xff]  ;;  %v303_v12 = vlaneseq }
  0x40   :  { %456 = vmatprep.subr.mxu0 %v649_v0  ;;  %491 = vmatprep.subr.mxu1 %v649_v0  ;;  %v298_v36 = vld [vmem:[#allocation8 + $0xe8] sm:$0xff]  ;;  %v297_v37 = vld [vmem:[#allocation8 + $0xe0] sm:$0xff]  ;;  %v296_v38 = vld [vmem:[#allocation8 + $0xd8] sm:$0xff] }
  0x41   :  { %457 = vmatpush3.msra.mxu0 %v91_v9  ;;  %492 = vmatpush3.msra.mxu1 %v185_v14  ;;  %v295_v39 = vld [vmem:[#allocation8 + $0xd0] sm:$0xff]  ;;  %v294_v40 = vld [vmem:[#allocation8 + $0xc8] sm:$0xff]  ;;  %v293_v41 = vld [vmem:[#allocation8 + $0xc0] sm:$0xff] }
  0x42   :  { %458 = vmatprep.subr.mxu0 %v649_v0  ;;  %493 = vmatprep.subr.mxu1 %v649_v0  ;;  %v292_v42 = vld [vmem:[#allocation8 + $0xb8] sm:$0xff]  ;;  %v291_v43 = vld [vmem:[#allocation8 + $0xb0] sm:$0xff]  ;;  %v290_v44 = vld [vmem:[#allocation8 + $0xa8] sm:$0xff] }
  0x43   :  { %459 = vmatpush3.msra.mxu0 %v90_v11  ;;  %494 = vmatpush3.msra.mxu1 %v184_v16  ;;  %v289_v45 = vld [vmem:[#allocation8 + $0xa0] sm:$0xff]  ;;  %v288_v46 = vld [vmem:[#allocation8 + $0x98] sm:$0xff]  ;;  %v287_v47 = vld [vmem:[#allocation8 + $0x90] sm:$0xff] }
  0x44   :  { %460 = vmatprep.subr.mxu0 %v649_v0  ;;  %495 = vmatprep.subr.mxu1 %v649_v0  ;;  %v286_v48 = vld [vmem:[#allocation8 + $0x88] sm:$0xff]  ;;  %v285_v49 = vld [vmem:[#allocation8 + $0x80] sm:$0xff]  ;;  %v284_v50 = vld [vmem:[#allocation8 + $0x78] sm:$0xff] }
  0x45   :  { %461 = vmatpush3.msra.mxu0 %v89_v13  ;;  %496 = vmatpush3.msra.mxu1 %v183_v18  ;;  %v283_v51 = vld [vmem:[#allocation8 + $0x70] sm:$0xff]  ;;  %v282_v52 = vld [vmem:[#allocation8 + $0x68] sm:$0xff]  ;;  %v281_v53 = vld [vmem:[#allocation8 + $0x60] sm:$0xff]  ;;  %v304_v13 = vshrl.u32 %v303_v12, 7 }
  0x46   :  { %462 = vmatprep.subr.mxu0 %v649_v0  ;;  %497 = vmatprep.subr.mxu1 %v649_v0  ;;  %v280_v54 = vld [vmem:[#allocation8 + $0x58] sm:$0xff]  ;;  %v279_v55 = vld [vmem:[#allocation8 + $0x50] sm:$0xff]  ;;  %v278_v56 = vld [vmem:[#allocation8 + $0x48] sm:$0xff] }
  0x47   :  { %463 = vmatpush3.msra.mxu0 %v88_v15  ;;  %498 = vmatpush3.msra.mxu1 %v182_v20  ;;  %v277_v57 = vld [vmem:[#allocation8 + $0x40] sm:$0xff]  ;;  %v276_v58 = vld [vmem:[#allocation8 + $0x38] sm:$0xff]  ;;  %v275_v59 = vld [vmem:[#allocation8 + $0x30] sm:$0xff]  ;;  %v305_v14 = vsub.s32 0, %v304_v13  ;;  %v309_v16 = vsub.s32 1, %v304_v13 }
  0x48   :  { %464 = vmatprep.subr.mxu0 %v649_v0  ;;  %499 = vmatprep.subr.mxu1 %v649_v0  ;;  %v274_v60 = vld [vmem:[#allocation8 + $0x28] sm:$0xff]  ;;  %v410_v61 = vld [vmem:[%s753_s2] ss:$0 sm:$0xff]  ;;  %v273_v2 = vld [vmem:[#allocation8 + $0x20] sm:$0xff] }
  0x49   :  { %465 = vmatpush3.msra.mxu0 %v87_v17  ;;  %500 = vmatpush3.msra.mxu1 %v181_v22  ;;  %v272_v3 = vld [vmem:[#allocation8 + $0x18] sm:$0xff]  ;;  %v271_v4 = vld [vmem:[#allocation8 + $0x10] sm:$0xff]  ;;  %v270_v5 = vld [vmem:[#allocation8 + $0x8] sm:$0xff] }
  0x4a   :  { %466 = vmatprep.subr.mxu0 %v649_v0  ;;  %501 = vmatprep.subr.mxu1 %v649_v0  ;;  %v269_v6 = vld [vmem:[#allocation8] sm:$0xff]  ;;  %v411_v7 = vld [vmem:[%s755_s4] ss:$0 sm:$0xff]  ;;  %s651_s4 = smov [#allocation10]  }
  0x4b   :  { %467 = vmatpush3.msra.mxu0 %v86_v19  ;;  %502 = vmatpush3.msra.mxu1 %v180_v24  ;;  %v301_v15 = vld [vmem:[%s757_s6] sm:$0x3]  ;;  %s399_s26 = sshll.u32 %s651_s4, 4  ;;  %s400_s26 = int_to_ptr.vmem [resolvable:$true] %s399_s26 }
  0x4c   :  { %468 = vmatprep.subr.mxu0 %v649_v0  ;;  %503 = vmatprep.subr.mxu1 %v649_v0  ;;  %v306_v17 = vrot.slane %v301_v15, %v305_v14  ;;  %v310_v18 = vrot.slane %v301_v15, %v309_v16  ;;  %s613_s6 = scalar_lea.vmem %s400_s26, 384  ;;  %p618_p7 = scmp.lt.s32.totalorder %s400_s26, %s400_s26 }
  0x4d   :  { %469 = vmatpush3.msra.mxu0 %v85_v21  ;;  %504 = vmatpush3.msra.mxu1 %v179_v26  ;;  %p614_p6 = scmp.ne.s32.totalorder %s400_s26, %s613_s6  ;;  %p619_p8 = scmp.lt.s32.totalorder %s613_s6, %s613_s6 }
  0x4e   :  { %470 = vmatprep.subr.mxu0 %v649_v0  ;;  %505 = vmatprep.subr.mxu1 %v649_v0 }
  0x4f   :  { %471 = vmatpush3.msra.mxu0 %v84_v23  ;;  %506 = vmatpush3.msra.mxu1 %v178_v28  ;;  %p620_p9 = por %p619_p8, %p618_p7 }
  0x50   :  { %472 = vmatprep.subr.mxu0 %v649_v0  ;;  %507 = vmatprep.subr.mxu1 %v649_v0 }
  0x51   :  { %473 = vmatpush3.msra.mxu0 %v83_v25  ;;  %508 = vmatpush3.msra.mxu1 %v177_v31  ;;  %p621_p10 = pnand %p620_p9, %p614_p6 }
  0x52   :  { %474 = vmatprep.subr.mxu0 %v649_v0  ;;  %509 = vmatprep.subr.mxu1 %v649_v0 }
  0x53   :  { %475 = vmatpush3.msra.mxu0 %v82_v27  ;;  %510 = vmatpush3.msra.mxu1 %v176_v32 }
  0x54   :  { %476 = vmatprep.subr.mxu0 %v649_v0  ;;  %511 = vmatprep.subr.mxu1 %v649_v0 }
  0x55   :  { %477 = vmatpush3.msra.mxu0 %v81_v29  ;;  %512 = vmatpush3.msra.mxu1 %v175_v33 }
  0x56   :  { %479 = vmatmul.mubr.f32.vlgmr.msra.gmra.mxu0 %v80_v30  ;;  %313 = vmatprep.subr.mxu0 %v300_v34 }
  0x57   :  { %377 = vmatprep.mubr.f32.mxu0 %v649_v0  ;;  %314 = vmatpush1.msra.mxu0 %v299_v35 }
  0x58   :  { %315 = vmatprep.subr.mxu0 %v298_v36 }
  0x59   :  { %316 = vmatpush1.msra.mxu0 %v297_v37 }
  0x5a   :  { %317 = vmatprep.subr.mxu0 %v296_v38 }
  0x5b   :  { %318 = vmatpush1.msra.mxu0 %v295_v39 }
  0x5c   :  { %319 = vmatprep.subr.mxu0 %v294_v40 }
  0x5d   :  { %320 = vmatpush1.msra.mxu0 %v293_v41 }
  0x5e   :  { %321 = vmatprep.subr.mxu0 %v292_v42 }
  0x5f   :  { %322 = vmatpush1.msra.mxu0 %v291_v43 }
  0x60   :  { %323 = vmatprep.subr.mxu0 %v290_v44 }
  0x61   :  { %324 = vmatpush1.msra.mxu0 %v289_v45 }
  0x62   :  { %325 = vmatprep.subr.mxu0 %v288_v46 }
  0x63   :  { %326 = vmatpush1.msra.mxu0 %v287_v47 }
  0x64   :  { %327 = vmatprep.subr.mxu0 %v286_v48 }
  0x65   :  { %328 = vmatpush1.msra.mxu0 %v285_v49 }
  0x66   :  { %329 = vmatprep.subr.mxu0 %v284_v50 }
  0x67   :  { %330 = vmatpush1.msra.mxu0 %v283_v51 }
  0x68   :  { %331 = vmatprep.subr.mxu0 %v282_v52 }
  0x69   :  { %332 = vmatpush1.msra.mxu0 %v281_v53 }
  0x6a   :  { %333 = vmatprep.subr.mxu0 %v280_v54 }
  0x6b   :  { %334 = vmatpush1.msra.mxu0 %v279_v55 }
  0x6c   :  { %335 = vmatprep.subr.mxu0 %v278_v56 }
  0x6d   :  { %336 = vmatpush1.msra.mxu0 %v277_v57 }
  0x6e   :  { %337 = vmatprep.subr.mxu0 %v276_v58 }
  0x6f   :  { %338 = vmatpush1.msra.mxu0 %v275_v59 }
  0x70   :  { %339 = vmatprep.subr.mxu0 %v274_v60 }
  0x71   :  { %340 = vmatpush1.msra.mxu0 %v273_v2 }
  0x72   :  { %341 = vmatprep.subr.mxu0 %v272_v3 }
  0x73   :  { %342 = vmatpush1.msra.mxu0 %v271_v4 }
  0x74   :  { %343 = vmatprep.subr.mxu0 %v270_v5 }
  0x75   :  { %344 = vmatpush1.msra.mxu0 %v269_v6 }
 0x116   :  { %v170_v62 = vpop.f32.mrf.mxu0 }
 0x117   :  { %v171_v63 = vadd.f32 %v410_v61, %v170_v62 }
 0x118   :  { %v480_v0 = vpop.f32.mrf.mxu0 }
 0x119   :  { %v174_v1 = vmax.f32 %v171_v63, 0.0 }
 0x11b   :  { %514 = vmatmul.mubr.f32.vlgmr.msra.gmra.mxu1 %v174_v1 }
 0x1db   :  { %v264_v8 = vpop.f32.mrf.mxu1 }
 0x1dc   :  { %v265_v9 = vadd.f32 %v411_v7, %v264_v8 }
 0x1dd   :  { %v515_v10 = vpop.f32.mrf.mxu1 }
 0x1de   :  { %v268_v11 = vmax.f32 %v265_v9, 0.0 }
 0x1e0   :  { %378 = vmatmul.mubr.f32.vlgmr.msra.gmra.mxu0 %v268_v11 }
 0x2a0   :  { %v379_v19 = vpop.f32.mrf.mxu0 }
 0x2a1   :  { %v380_v20 = vadd.f32 %v379_v19, %v306_v17 }
 0x2a2   :  { %v381_v21 = vpop.f32.mrf.mxu0 }
 0x2a3   :  { %387 = vst [vmem:[#allocation10] sm:$0xff] %v380_v20  ;;  %527 = vtanh.f32 %v380_v20  ;;  %v382_v22 = vadd.f32 %v381_v21, %v310_v18 }
 0x2a5   :  { %529 = vtanh.f32 %v382_v22 }
 0x2b0   :  { %v528_v23 = vpop.eup %527 }
 0x2b1   :  { %392 = vst [vmem:[#allocation10 + $0x10] sm:$0xff] %v528_v23 }
 0x2b2   :  { %v530_v24 = vpop.eup %529 }
 0x2b3   :  { %v385_v25 = vmul.f32 3.5, %v530_v24 }
 0x2b5   :  { %v386_v26 = vadd.f32 -1.5, %v385_v25 }
 0x2b7   :  { %v388_v27 = vmul.f32 1.442695, %v386_v26 }
 0x2b9   :  { %531 = vpow2.f32 %v388_v27 }
 0x2c6   :  { %v532_v28 = vpop.eup %531 }
 0x2c7   :  { %390 = vst [vmem:[#allocation10 + $0x8] sm:$0xff] %v532_v28 }
 0x2c8   :  { %624 = shalt.err (!%p621_p10)
}
 0x2c9   :  { %402 = dma.vmem_to_hbm [thread:$0]  %s400_s26, 384, %s758_s7, [#allocation4]  }
 0x2ca   :  { %639 = dma.done.wait [#allocation4], 384  }
 0x2cb   :  { %640 = vsyncadd [#allocation4], 4294966912 }
 0x2cc   :  { %406 = vsyncpa [#allocation3], 1 }
 0x2cd   :  { %407 = vsyncpa [#allocation6], 1 }
 0x2ce   :  { %408 = vsyncpa [#allocation9], 1 }
 0x2cf   :  { %409 = vsyncpa [#allocation4], 1 }

// kernel: tpu_custom_call.1
= control target key start
LH: loop header
LB: loop body
LE: loop exit
PB: predicated region body
PF: predicated region fallthrough
CT: control target
= control target key end

     0   :  { %12 = vsyncpa [#allocation3], 0  ;;  %s751_s0 = inlined_call_operand.hbm [shape: f32[8,128], index: 0, kind: input, shape index: {}]   ;;  %s752_s1 = inlined_call_operand.hbm [shape: f32[128,128], index: 1, kind: input, shape index: {}]   ;;  %s753_s2 = inlined_call_operand.vmem [shape: f32[1,128], index: 2, kind: input, shape index: {}]   ;;  %s754_s3 = inlined_call_operand.hbm [shape: f32[128,128], index: 3, kind: input, shape index: {}]   ;;  %s755_s4 = inlined_call_operand.vmem [shape: f32[1,128], index: 4, kind: input, shape index: {}]   ;;  %s756_s5 = inlined_call_operand.hbm [shape: f32[128,256], index: 5, kind: input, shape index: {}]   ;;  %s757_s6 = inlined_call_operand.vmem [shape: f32[1,256], index: 6, kind: input, shape index: {}]   ;;  %s758_s7 = inlined_call_operand.hbm [shape: f32[8,384], index: 7, kind: output, shape index: {}]  }
   0x1   :  { %13 = vsyncpa [#allocation6], 0 }
   0x2   :  { %14 = vsyncpa [#allocation9], 0 }
   0x3   :  { %15 = vsyncpa [#allocation4], 0  ;;  %s641_s24 = smov [#allocation5]  }
   0x4   :  { %s31_s25 = sshll.u32 %s641_s24, 4  ;;  %s32_s25 = int_to_ptr.vmem [resolvable:$true] %s31_s25 }
   0x5   :  { %s541_s26 = scalar_lea.vmem %s32_s25, 2048  ;;  %p546_p1 = scmp.lt.s32.totalorder %s32_s25, %s32_s25 }
   0x6   :  { %p542_p0 = scmp.ne.s32.totalorder %s32_s25, %s541_s26  ;;  %p547_p2 = scmp.lt.s32.totalorder %s541_s26, %s541_s26 }
   0x8   :  { %p548_p3 = por %p547_p2, %p546_p1 }
   0xa   :  { %p549_p4 = pnand %p548_p3, %p542_p0 }
   0xc   :  { %552 = shalt.err (!%p549_p4)
}
   0xd   :  { %s642_s27 = smov 128   ;;  %s643_s28 = smov 8  }
   0xe   :  { %37 = dma.hbm_to_vmem [thread:$0]  %s752_s1, 2048, %s32_s25, [#allocation6], %s642_s27, %s642_s27, %s643_s28  }
   0xf   :  { %s644_s8 = smov [#allocation2]   ;;  %s645_s10 = smov [#allocation7]  }
  0x10   :  { %s22_s9 = sshll.u32 %s644_s8, 4  ;;  %s45_s11 = sshll.u32 %s645_s10, 4  ;;  %s23_s9 = int_to_ptr.vmem [resolvable:$true] %s22_s9  ;;  %s46_s11 = int_to_ptr.vmem [resolvable:$true] %s45_s11 }
  0x11   :  { %s561_s12 = scalar_lea.vmem %s23_s9, 128  ;;  %p566_p6 = scmp.lt.s32.totalorder %s23_s9, %s23_s9 }
  0x12   :  { %p562_p5 = scmp.ne.s32.totalorder %s23_s9, %s561_s12  ;;  %p567_p7 = scmp.lt.s32.totalorder %s561_s12, %s561_s12 }
  0x14   :  { %p568_p8 = por %p567_p7, %p566_p6 }
  0x16   :  { %p569_p9 = pnand %p568_p8, %p562_p5 }
  0x18   :  { %572 = shalt.err (!%p569_p9)
}
  0x19   :  { %25 = dma.hbm_to_vmem [thread:$0]  %s751_s0, 128, %s23_s9, [#allocation3]  }
  0x1a   :  { %s581_s15 = scalar_lea.vmem %s46_s11, 2048  ;;  %p586_p11 = scmp.lt.s32.totalorder %s46_s11, %s46_s11 }
  0x1b   :  { %p582_p10 = scmp.ne.s32.totalorder %s46_s11, %s581_s15  ;;  %p587_p12 = scmp.lt.s32.totalorder %s581_s15, %s581_s15 }
  0x1d   :  { %p588_p13 = por %p587_p12, %p586_p11 }
  0x1f   :  { %p589_p0 = pnand %p588_p13, %p582_p10 }
  0x21   :  { %592 = shalt.err (!%p589_p0)
}
  0x22   :  { %51 = dma.hbm_to_vmem [thread:$0]  %s754_s3, 2048, %s46_s11, [#allocation6], %s642_s27, %s642_s27, %s643_s28  }
  0x23   :  { %s646_s17 = smov [#allocation8]  }
  0x24   :  { %s59_s18 = sshll.u32 %s646_s17, 4  ;;  %s60_s18 = int_to_ptr.vmem [resolvable:$true] %s59_s18 }
  0x25   :  { %s601_s19 = scalar_lea.vmem %s60_s18, 4096  ;;  %p606_p2 = scmp.lt.s32.totalorder %s60_s18, %s60_s18 }
  0x26   :  { %p602_p1 = scmp.ne.s32.totalorder %s60_s18, %s601_s19  ;;  %p607_p3 = scmp.lt.s32.totalorder %s601_s19, %s601_s19 }
  0x28   :  { %p608_p4 = por %p607_p3, %p606_p2 }
  0x2a   :  { %p609_p5 = pnand %p608_p4, %p602_p1 }
  0x2c   :  { %612 = shalt.err (!%p609_p5)
}
  0x2d   :  { %s647_s0 = smov 256   ;;  %s648_s20 = smov 16  }
  0x2e   :  { %65 = dma.hbm_to_vmem [thread:$0]  %s756_s5, 4096, %s60_s18, [#allocation9], %s647_s0, %s647_s0, %s648_s20  }
  0x2f   :  { %633 = dma.done.wait [#allocation3], 128  }
  0x30   :  { %634 = vsyncadd [#allocation3], 4294967168 }
  0x31   :  { %635 = dma.done.wait [#allocation6], 4096  }
  0x32   :  { %636 = vsyncadd [#allocation6], 4294963200 }
  0x33   :  { %637 = dma.done.wait [#allocation9], 4096  }
  0x34   :  { %638 = vsyncadd [#allocation9], 4294963200  ;;  %v649_v0 = vmov 0.0   ;;  %vm650_vm0 = vmmov 0   ;;  %v96_v1 = vld [vmem:[#allocation5 + $0x78] sm:$0xff]  ;;  %v95_v2 = vld [vmem:[#allocation5 + $0x70] sm:$0xff] }
  0x35   :  { %446 = vmatprep.subr.mxu0 %v649_v0  ;;  %478 = vmatprep.mubr.msk.f32.mxu0 %vm650_vm0, %v649_v0  ;;  %v94_v3 = vld [vmem:[#allocation5 + $0x68] sm:$0xff]  ;;  %v93_v4 = vld [vmem:[#allocation5 + $0x60] sm:$0xff]  ;;  %v190_v5 = vld [vmem:[#allocation7 + $0x78] sm:$0xff] }
  0x36   :  { %481 = vmatprep.subr.mxu1 %v649_v0  ;;  %513 = vmatprep.mubr.msk.f32.mxu1 %vm650_vm0, %v649_v0  ;;  %v92_v6 = vld [vmem:[#allocation5 + $0x58] sm:$0xff]  ;;  %v189_v7 = vld [vmem:[#allocation7 + $0x70] sm:$0xff]  ;;  %v188_v8 = vld [vmem:[#allocation7 + $0x68] sm:$0xff] }
  0x37   :  { %447 = vmatpush3.msra.mxu0 %v96_v1  ;;  %482 = vmatpush3.msra.mxu1 %v190_v5  ;;  %v91_v9 = vld [vmem:[#allocation5 + $0x50] sm:$0xff]  ;;  %v187_v10 = vld [vmem:[#allocation7 + $0x60] sm:$0xff]  ;;  %v90_v11 = vld [vmem:[#allocation5 + $0x48] sm:$0xff] }
  0x38   :  { %448 = vmatprep.subr.mxu0 %v649_v0  ;;  %483 = vmatprep.subr.mxu1 %v649_v0  ;;  %v186_v12 = vld [vmem:[#allocation7 + $0x58] sm:$0xff]  ;;  %v89_v13 = vld [vmem:[#allocation5 + $0x40] sm:$0xff]  ;;  %v185_v14 = vld [vmem:[#allocation7 + $0x50] sm:$0xff] }
  0x39   :  { %449 = vmatpush3.msra.mxu0 %v95_v2  ;;  %484 = vmatpush3.msra.mxu1 %v189_v7  ;;  %v88_v15 = vld [vmem:[#allocation5 + $0x38] sm:$0xff]  ;;  %v184_v16 = vld [vmem:[#allocation7 + $0x48] sm:$0xff]  ;;  %v87_v17 = vld [vmem:[#allocation5 + $0x30] sm:$0xff] }
  0x3a   :  { %450 = vmatprep.subr.mxu0 %v649_v0  ;;  %485 = vmatprep.subr.mxu1 %v649_v0  ;;  %v183_v18 = vld [vmem:[#allocation7 + $0x40] sm:$0xff]  ;;  %v86_v19 = vld [vmem:[#allocation5 + $0x28] sm:$0xff]  ;;  %v182_v20 = vld [vmem:[#allocation7 + $0x38] sm:$0xff] }
  0x3b   :  { %451 = vmatpush3.msra.mxu0 %v94_v3  ;;  %486 = vmatpush3.msra.mxu1 %v188_v8  ;;  %v85_v21 = vld [vmem:[#allocation5 + $0x20] sm:$0xff]  ;;  %v181_v22 = vld [vmem:[#allocation7 + $0x30] sm:$0xff]  ;;  %v84_v23 = vld [vmem:[#allocation5 + $0x18] sm:$0xff] }
  0x3c   :  { %452 = vmatprep.subr.mxu0 %v649_v0  ;;  %487 = vmatprep.subr.mxu1 %v649_v0  ;;  %v180_v24 = vld [vmem:[#allocation7 + $0x28] sm:$0xff]  ;;  %v83_v25 = vld [vmem:[#allocation5 + $0x10] sm:$0xff]  ;;  %v179_v26 = vld [vmem:[#allocation7 + $0x20] sm:$0xff] }
  0x3d   :  { %453 = vmatpush3.msra.mxu0 %v93_v4  ;;  %488 = vmatpush3.msra.mxu1 %v187_v10  ;;  %v82_v27 = vld [vmem:[#allocation5 + $0x8] sm:$0xff]  ;;  %v178_v28 = vld [vmem:[#allocation7 + $0x18] sm:$0xff]  ;;  %v81_v29 = vld [vmem:[#allocation5] sm:$0xff] }
  0x3e   :  { %454 = vmatprep.subr.mxu0 %v649_v0  ;;  %489 = vmatprep.subr.mxu1 %v649_v0  ;;  %v80_v30 = vld [vmem:[#allocation2] sm:$0xff]  ;;  %v177_v31 = vld [vmem:[#allocation7 + $0x10] sm:$0xff]  ;;  %v176_v32 = vld [vmem:[#allocation7 + $0x8] sm:$0xff] }
  0x3f   :  { %455 = vmatpush3.msra.mxu0 %v92_v6  ;;  %490 = vmatpush3.msra.mxu1 %v186_v12  ;;  %v175_v33 = vld [vmem:[#allocation7] sm:$0xff]  ;;  %v300_v34 = vld [vmem:[#allocation8 + $0xf8] sm:$0xff]  ;;  %v299_v35 = vld [vmem:[#allocation8 + $0xf0] sm:$0xff]  ;;  %v303_v12 = vlaneseq }
  0x40   :  { %456 = vmatprep.subr.mxu0 %v649_v0  ;;  %491 = vmatprep.subr.mxu1 %v649_v0  ;;  %v298_v36 = vld [vmem:[#allocation8 + $0xe8] sm:$0xff]  ;;  %v297_v37 = vld [vmem:[#allocation8 + $0xe0] sm:$0xff]  ;;  %v296_v38 = vld [vmem:[#allocation8 + $0xd8] sm:$0xff] }
  0x41   :  { %457 = vmatpush3.msra.mxu0 %v91_v9  ;;  %492 = vmatpush3.msra.mxu1 %v185_v14  ;;  %v295_v39 = vld [vmem:[#allocation8 + $0xd0] sm:$0xff]  ;;  %v294_v40 = vld [vmem:[#allocation8 + $0xc8] sm:$0xff]  ;;  %v293_v41 = vld [vmem:[#allocation8 + $0xc0] sm:$0xff] }
  0x42   :  { %458 = vmatprep.subr.mxu0 %v649_v0  ;;  %493 = vmatprep.subr.mxu1 %v649_v0  ;;  %v292_v42 = vld [vmem:[#allocation8 + $0xb8] sm:$0xff]  ;;  %v291_v43 = vld [vmem:[#allocation8 + $0xb0] sm:$0xff]  ;;  %v290_v44 = vld [vmem:[#allocation8 + $0xa8] sm:$0xff] }
  0x43   :  { %459 = vmatpush3.msra.mxu0 %v90_v11  ;;  %494 = vmatpush3.msra.mxu1 %v184_v16  ;;  %v289_v45 = vld [vmem:[#allocation8 + $0xa0] sm:$0xff]  ;;  %v288_v46 = vld [vmem:[#allocation8 + $0x98] sm:$0xff]  ;;  %v287_v47 = vld [vmem:[#allocation8 + $0x90] sm:$0xff] }
  0x44   :  { %460 = vmatprep.subr.mxu0 %v649_v0  ;;  %495 = vmatprep.subr.mxu1 %v649_v0  ;;  %v286_v48 = vld [vmem:[#allocation8 + $0x88] sm:$0xff]  ;;  %v285_v49 = vld [vmem:[#allocation8 + $0x80] sm:$0xff]  ;;  %v284_v50 = vld [vmem:[#allocation8 + $0x78] sm:$0xff] }
  0x45   :  { %461 = vmatpush3.msra.mxu0 %v89_v13  ;;  %496 = vmatpush3.msra.mxu1 %v183_v18  ;;  %v283_v51 = vld [vmem:[#allocation8 + $0x70] sm:$0xff]  ;;  %v282_v52 = vld [vmem:[#allocation8 + $0x68] sm:$0xff]  ;;  %v281_v53 = vld [vmem:[#allocation8 + $0x60] sm:$0xff]  ;;  %v304_v13 = vshrl.u32 %v303_v12, 7 }
  0x46   :  { %462 = vmatprep.subr.mxu0 %v649_v0  ;;  %497 = vmatprep.subr.mxu1 %v649_v0  ;;  %v280_v54 = vld [vmem:[#allocation8 + $0x58] sm:$0xff]  ;;  %v279_v55 = vld [vmem:[#allocation8 + $0x50] sm:$0xff]  ;;  %v278_v56 = vld [vmem:[#allocation8 + $0x48] sm:$0xff] }
  0x47   :  { %463 = vmatpush3.msra.mxu0 %v88_v15  ;;  %498 = vmatpush3.msra.mxu1 %v182_v20  ;;  %v277_v57 = vld [vmem:[#allocation8 + $0x40] sm:$0xff]  ;;  %v276_v58 = vld [vmem:[#allocation8 + $0x38] sm:$0xff]  ;;  %v275_v59 = vld [vmem:[#allocation8 + $0x30] sm:$0xff]  ;;  %v305_v14 = vsub.s32 0, %v304_v13  ;;  %v309_v16 = vsub.s32 1, %v304_v13 }
  0x48   :  { %464 = vmatprep.subr.mxu0 %v649_v0  ;;  %499 = vmatprep.subr.mxu1 %v649_v0  ;;  %v274_v60 = vld [vmem:[#allocation8 + $0x28] sm:$0xff]  ;;  %v410_v61 = vld [vmem:[%s753_s2] ss:$0 sm:$0xff]  ;;  %v273_v2 = vld [vmem:[#allocation8 + $0x20] sm:$0xff] }
  0x49   :  { %465 = vmatpush3.msra.mxu0 %v87_v17  ;;  %500 = vmatpush3.msra.mxu1 %v181_v22  ;;  %v272_v3 = vld [vmem:[#allocation8 + $0x18] sm:$0xff]  ;;  %v271_v4 = vld [vmem:[#allocation8 + $0x10] sm:$0xff]  ;;  %v270_v5 = vld [vmem:[#allocation8 + $0x8] sm:$0xff] }
  0x4a   :  { %466 = vmatprep.subr.mxu0 %v649_v0  ;;  %501 = vmatprep.subr.mxu1 %v649_v0  ;;  %v269_v6 = vld [vmem:[#allocation8] sm:$0xff]  ;;  %v411_v7 = vld [vmem:[%s755_s4] ss:$0 sm:$0xff]  ;;  %s651_s4 = smov [#allocation10]  }
  0x4b   :  { %467 = vmatpush3.msra.mxu0 %v86_v19  ;;  %502 = vmatpush3.msra.mxu1 %v180_v24  ;;  %v301_v15 = vld [vmem:[%s757_s6] sm:$0x3]  ;;  %s399_s26 = sshll.u32 %s651_s4, 4  ;;  %s400_s26 = int_to_ptr.vmem [resolvable:$true] %s399_s26 }
  0x4c   :  { %468 = vmatprep.subr.mxu0 %v649_v0  ;;  %503 = vmatprep.subr.mxu1 %v649_v0  ;;  %v306_v17 = vrot.slane %v301_v15, %v305_v14  ;;  %v310_v18 = vrot.slane %v301_v15, %v309_v16  ;;  %s613_s6 = scalar_lea.vmem %s400_s26, 384  ;;  %p618_p7 = scmp.lt.s32.totalorder %s400_s26, %s400_s26 }
  0x4d   :  { %469 = vmatpush3.msra.mxu0 %v85_v21  ;;  %504 = vmatpush3.msra.mxu1 %v179_v26  ;;  %p614_p6 = scmp.ne.s32.totalorder %s400_s26, %s613_s6  ;;  %p619_p8 = scmp.lt.s32.totalorder %s613_s6, %s613_s6 }
  0x4e   :  { %470 = vmatprep.subr.mxu0 %v649_v0  ;;  %505 = vmatprep.subr.mxu1 %v649_v0 }
  0x4f   :  { %471 = vmatpush3.msra.mxu0 %v84_v23  ;;  %506 = vmatpush3.msra.mxu1 %v178_v28  ;;  %p620_p9 = por %p619_p8, %p618_p7 }
  0x50   :  { %472 = vmatprep.subr.mxu0 %v649_v0  ;;  %507 = vmatprep.subr.mxu1 %v649_v0 }
  0x51   :  { %473 = vmatpush3.msra.mxu0 %v83_v25  ;;  %508 = vmatpush3.msra.mxu1 %v177_v31  ;;  %p621_p10 = pnand %p620_p9, %p614_p6 }
  0x52   :  { %474 = vmatprep.subr.mxu0 %v649_v0  ;;  %509 = vmatprep.subr.mxu1 %v649_v0 }
  0x53   :  { %475 = vmatpush3.msra.mxu0 %v82_v27  ;;  %510 = vmatpush3.msra.mxu1 %v176_v32 }
  0x54   :  { %476 = vmatprep.subr.mxu0 %v649_v0  ;;  %511 = vmatprep.subr.mxu1 %v649_v0 }
  0x55   :  { %477 = vmatpush3.msra.mxu0 %v81_v29  ;;  %512 = vmatpush3.msra.mxu1 %v175_v33 }
  0x56   :  { %479 = vmatmul.mubr.f32.vlgmr.msra.gmra.mxu0 %v80_v30  ;;  %313 = vmatprep.subr.mxu0 %v300_v34 }
  0x57   :  { %377 = vmatprep.mubr.f32.mxu0 %v649_v0  ;;  %314 = vmatpush1.msra.mxu0 %v299_v35 }
  0x58   :  { %315 = vmatprep.subr.mxu0 %v298_v36 }
  0x59   :  { %316 = vmatpush1.msra.mxu0 %v297_v37 }
  0x5a   :  { %317 = vmatprep.subr.mxu0 %v296_v38 }
  0x5b   :  { %318 = vmatpush1.msra.mxu0 %v295_v39 }
  0x5c   :  { %319 = vmatprep.subr.mxu0 %v294_v40 }
  0x5d   :  { %320 = vmatpush1.msra.mxu0 %v293_v41 }
  0x5e   :  { %321 = vmatprep.subr.mxu0 %v292_v42 }
  0x5f   :  { %322 = vmatpush1.msra.mxu0 %v291_v43 }
  0x60   :  { %323 = vmatprep.subr.mxu0 %v290_v44 }
  0x61   :  { %324 = vmatpush1.msra.mxu0 %v289_v45 }
  0x62   :  { %325 = vmatprep.subr.mxu0 %v288_v46 }
  0x63   :  { %326 = vmatpush1.msra.mxu0 %v287_v47 }
  0x64   :  { %327 = vmatprep.subr.mxu0 %v286_v48 }
  0x65   :  { %328 = vmatpush1.msra.mxu0 %v285_v49 }
  0x66   :  { %329 = vmatprep.subr.mxu0 %v284_v50 }
  0x67   :  { %330 = vmatpush1.msra.mxu0 %v283_v51 }
  0x68   :  { %331 = vmatprep.subr.mxu0 %v282_v52 }
  0x69   :  { %332 = vmatpush1.msra.mxu0 %v281_v53 }
  0x6a   :  { %333 = vmatprep.subr.mxu0 %v280_v54 }
  0x6b   :  { %334 = vmatpush1.msra.mxu0 %v279_v55 }
  0x6c   :  { %335 = vmatprep.subr.mxu0 %v278_v56 }
  0x6d   :  { %336 = vmatpush1.msra.mxu0 %v277_v57 }
  0x6e   :  { %337 = vmatprep.subr.mxu0 %v276_v58 }
  0x6f   :  { %338 = vmatpush1.msra.mxu0 %v275_v59 }
  0x70   :  { %339 = vmatprep.subr.mxu0 %v274_v60 }
  0x71   :  { %340 = vmatpush1.msra.mxu0 %v273_v2 }
  0x72   :  { %341 = vmatprep.subr.mxu0 %v272_v3 }
  0x73   :  { %342 = vmatpush1.msra.mxu0 %v271_v4 }
  0x74   :  { %343 = vmatprep.subr.mxu0 %v270_v5 }
  0x75   :  { %344 = vmatpush1.msra.mxu0 %v269_v6 }
 0x116   :  { %v170_v62 = vpop.f32.mrf.mxu0 }
 0x117   :  { %v171_v63 = vadd.f32 %v410_v61, %v170_v62 }
 0x118   :  { %v480_v0 = vpop.f32.mrf.mxu0 }
 0x119   :  { %v174_v1 = vmax.f32 %v171_v63, 0.0 }
 0x11b   :  { %514 = vmatmul.mubr.f32.vlgmr.msra.gmra.mxu1 %v174_v1 }
 0x1db   :  { %v264_v8 = vpop.f32.mrf.mxu1 }
 0x1dc   :  { %v265_v9 = vadd.f32 %v411_v7, %v264_v8 }
 0x1dd   :  { %v515_v10 = vpop.f32.mrf.mxu1 }
 0x1de   :  { %v268_v11 = vmax.f32 %v265_v9, 0.0 }
 0x1e0   :  { %378 = vmatmul.mubr.f32.vlgmr.msra.gmra.mxu0 %v268_v11 }
 0x2a0   :  { %v379_v19 = vpop.f32.mrf.mxu0 }
 0x2a1   :  { %v380_v20 = vadd.f32 %v379_v19, %v306_v17 }
 0x2a2   :  { %v381_v21 = vpop.f32.mrf.mxu0 }
 0x2a3   :  { %387 = vst [vmem:[#allocation10] sm:$0xff] %v380_v20  ;;  %527 = vtanh.f32 %v380_v20  ;;  %v382_v22 = vadd.f32 %v381_v21, %v310_v18 }
 0x2a5   :  { %529 = vtanh.f32 %v382_v22 }
 0x2b0   :  { %v528_v23 = vpop.eup %527 }
 0x2b1   :  { %392 = vst [vmem:[#allocation10 + $0x10] sm:$0xff] %v528_v23 }
 0x2b2   :  { %v530_v24 = vpop.eup %529 }
 0x2b3   :  { %v385_v25 = vmul.f32 3.5, %v530_v24 }
 0x2b5   :  { %v386_v26 = vadd.f32 -1.5, %v385_v25 }
 0x2b7   :  { %v388_v27 = vmul.f32 1.442695, %v386_v26 }
 0x2b9   :  { %531 = vpow2.f32 %v388_v27 }
 0x2c6   :  { %v532_v28 = vpop.eup %531 }
 0x2c7   :  { %390 = vst [vmem:[#allocation10 + $0x8] sm:$0xff] %v532_v28 }
 0x2c8   :  { %624 = shalt.err (!%p621_p10)
}
 0x2c9   :  { %402 = dma.vmem_to_hbm [thread:$0]  %s400_s26, 384, %s758_s7, [#allocation4]  }
 0x2ca   :  { %639 = dma.done.wait [#allocation4], 384  }
 0x2cb   :  { %640 = vsyncadd [#allocation4], 4294966912 }
 0x2cc   :  { %406 = vsyncpa [#allocation3], 1 }
 0x2cd   :  { %407 = vsyncpa [#allocation6], 1 }
 0x2ce   :  { %408 = vsyncpa [#allocation9], 1 }
 0x2cf   :  { %409 = vsyncpa [#allocation4], 1 }

</bundles_post_ra>
